<compile_context>
chip_gen: v7x
topology: tpu7x:2x2x1
jax: 0.10.0
libtpu: 0.0.40
codegen_flags: <defaults>
</compile_context>

<pallas_src>
import math

import jax
import jax.numpy as jnp
from jax.experimental import pallas as pl
from jax.experimental.pallas import tpu as pltpu


def _round_up(a, b):
    return ((a + b - 1) // b) * b


def _sigmoid(x):
    return 1.0 / (1.0 + jnp.exp(-x))


# -----------------------------------------------------------------------------
# Kernel 1: time-parallel input-side projections, tiled over M = S*B rows.
# -----------------------------------------------------------------------------
def _proj_kernel(x_ref, f_ref, wih_ref, wfh_ref, bih_ref, bfh_ref,
                 gi_ref, gf_ref):
    gi = jnp.dot(x_ref[...], wih_ref[...], preferred_element_type=jnp.float32)
    gf = jnp.dot(f_ref[...], wfh_ref[...], preferred_element_type=jnp.float32)
    gi_ref[...] = (gi + bih_ref[...]).astype(gi_ref.dtype)
    gf_ref[...] = (gf + bfh_ref[...]).astype(gf_ref.dtype)


def _input_projections(x2d, f2d, wih_t, wfh_t, bih_row, bfh_row):
    M, Dx = x2d.shape
    Df = f2d.shape[1]
    G3 = wih_t.shape[1]   # 3H
    G2 = wfh_t.shape[1]   # 2H

    # Row tile: big enough to amortize per-step overhead, small enough that
    # 2x double-buffered (x, f, gi, gf) tiles + resident weights stay well
    # under VMEM on every generation (v7x has only 64 MiB).
    tm = min(256, _round_up(M, 8))
    m_pad = _round_up(M, tm)
    if m_pad != M:
        x2d = jnp.pad(x2d, ((0, m_pad - M), (0, 0)))
        f2d = jnp.pad(f2d, ((0, m_pad - M), (0, 0)))

    flops = 2 * m_pad * (Dx * G3 + Df * G2)
    bytes_accessed = 4 * (m_pad * (Dx + Df + G3 + G2)
                          + Dx * G3 + Df * G2 + G3 + G2)

    gi2d, gf2d = pl.pallas_call(
        _proj_kernel,
        out_shape=(jax.ShapeDtypeStruct((m_pad, G3), jnp.float32),
                   jax.ShapeDtypeStruct((m_pad, G2), jnp.float32)),
        grid=(m_pad // tm,),
        in_specs=[
            pl.BlockSpec((tm, Dx), lambda i: (i, 0)),
            pl.BlockSpec((tm, Df), lambda i: (i, 0)),
            pl.BlockSpec((Dx, G3), lambda i: (0, 0)),   # resident weights
            pl.BlockSpec((Df, G2), lambda i: (0, 0)),
            pl.BlockSpec((1, G3), lambda i: (0, 0)),
            pl.BlockSpec((1, G2), lambda i: (0, 0)),
        ],
        out_specs=(pl.BlockSpec((tm, G3), lambda i: (i, 0)),
                   pl.BlockSpec((tm, G2), lambda i: (i, 0))),
        compiler_params=pltpu.CompilerParams(
            dimension_semantics=("parallel",),       # megacore-shardable rows
            vmem_limit_bytes=32 * 1024 * 1024,
        ),
        cost_estimate=pl.CostEstimate(
            flops=int(flops), transcendentals=0,
            bytes_accessed=int(bytes_accessed)),
    )(x2d, f2d, wih_t, wfh_t, bih_row, bfh_row)
    return gi2d[:M], gf2d[:M]


# -----------------------------------------------------------------------------
# Kernel 2: sequential GRU-with-GCC recurrence, grid over time, h in VMEM.
# -----------------------------------------------------------------------------
def _recurrence_kernel(gi_ref, gf_ref, whh_ref, bhh_ref, out_ref, h_ref):
    H = h_ref.shape[-1]
    t = pl.program_id(0)

    @pl.when(t == 0)
    def _():
        h_ref[...] = jnp.zeros_like(h_ref)   # hx=None -> zeros

    h = h_ref[...]
    gh = jnp.dot(h, whh_ref[...], preferred_element_type=jnp.float32)
    gh = gh + bhh_ref[...]

    gi = gi_ref[0]          # (B, 3H)
    gf = gf_ref[0]          # (B, 2H)
    i_r, i_i, i_n = gi[:, :H], gi[:, H:2 * H], gi[:, 2 * H:]
    f_r, f_i = gf[:, :H], gf[:, H:]
    h_r, h_i, h_n = gh[:, :H], gh[:, H:2 * H], gh[:, 2 * H:]

    resetgate = _sigmoid(i_r + h_r + f_r)
    inputgate = _sigmoid(i_i + h_i + f_i)
    newgate = jnp.tanh(i_n + resetgate * h_n)
    hy = newgate + inputgate * (h - newgate)

    h_ref[...] = hy
    out_ref[0] = hy.astype(out_ref.dtype)


def _gru_recurrence(gi_seq, gf_seq, whh_t, bhh_row):
    S, B, G3 = gi_seq.shape
    G2 = gf_seq.shape[-1]
    H = whh_t.shape[0]
    return pl.pallas_call(
        _recurrence_kernel,
        out_shape=jax.ShapeDtypeStruct((S, B, H), jnp.float32),
        grid=(S,),
        in_specs=[
            pl.BlockSpec((1, B, G3), lambda t: (t, 0, 0)),
            pl.BlockSpec((1, B, G2), lambda t: (t, 0, 0)),
            pl.BlockSpec((H, G3), lambda t: (0, 0)),
            pl.BlockSpec((1, G3), lambda t: (0, 0)),
        ],
        out_specs=pl.BlockSpec((1, B, H), lambda t: (t, 0, 0)),
        scratch_shapes=[pltpu.VMEM((B, H), jnp.float32)],
        compiler_params=pltpu.CompilerParams(
            # Sequential carry through h_ref -> must stay "arbitrary".
            dimension_semantics=("arbitrary",)),
    )(gi_seq, gf_seq, whh_t, bhh_row)


@jax.jit
def _gru_gcc_forward(x, f_cat, wih_t, bih_row, wfh_t, bfh_row, whh_t, bhh_row):
    B, S, Dx = x.shape
    Df = f_cat.shape[-1]
    H = whh_t.shape[0]
    # Seq-major row order so each recurrence step reads one contiguous block.
    x2d = jnp.transpose(x, (1, 0, 2)).reshape(S * B, Dx)
    f2d = jnp.transpose(f_cat, (1, 0, 2)).reshape(S * B, Df)
    gi2d, gf2d = _input_projections(x2d, f2d, wih_t, wfh_t, bih_row, bfh_row)
    gi_seq = gi2d.reshape(S, B, 3 * H)
    gf_seq = gf2d.reshape(S, B, 2 * H)
    out_sbh = _gru_recurrence(gi_seq, gf_seq, whh_t, bhh_row)
    output = jnp.transpose(out_sbh, (1, 0, 2))   # (B, S, H)
    h_final = out_sbh[S - 1]                     # (B, H)
    return output, h_final


# -----------------------------------------------------------------------------
# Module wrapper: Encoder_Baseline (default GRU_with_GCC path).
# -----------------------------------------------------------------------------
class EncoderBaseline:
    def __init__(self, input_size, output_size, auxiliary_pos, skip_info, key):
        assert len(input_size) == len(output_size) == len(auxiliary_pos)
        assert len(input_size) == len(skip_info)
        assert sum(skip_info) != len(skip_info)
        self.input_size = list(input_size)
        self.output_size = list(output_size)
        self.auxiliary_pos = [list(p) for p in auxiliary_pos]
        self.skip_info = list(skip_info)
        self.params = []
        for i in range(len(input_size)):
            if skip_info[i]:
                self.params.append(None)
                continue
            H = output_size[i]
            Dx = input_size[i]
            aux_sizes = [input_size[p] for p in auxiliary_pos[i]]
            stdv = 1.0 / math.sqrt(H)
            key, k1, k2, k3, k4 = jax.random.split(key, 5)
            wih = jax.random.uniform(k1, (3 * H, Dx), jnp.float32, -stdv, stdv)
            bih = jax.random.uniform(k2, (3 * H,), jnp.float32, -stdv, stdv)
            whh = jax.random.uniform(k3, (3 * H, H), jnp.float32, -stdv, stdv)
            bhh = jax.random.uniform(k4, (3 * H,), jnp.float32, -stdv, stdv)
            wfh_list, bfh_list = [], []
            for fs in aux_sizes:
                key, ka, kb = jax.random.split(key, 3)
                wfh_list.append(
                    jax.random.uniform(ka, (2 * H, fs), jnp.float32, -stdv, stdv))
                bfh_list.append(
                    jax.random.uniform(kb, (2 * H,), jnp.float32, -stdv, stdv))
            if aux_sizes:
                # Fuse all auxiliary linears into a single matmul:
                # sum_j f_j @ W_j^T == concat(f_j) @ concat_rows(W_j^T).
                wfh_cat = jnp.concatenate(wfh_list, axis=1)          # (2H, sumDf)
                bfh_sum = jnp.sum(jnp.stack(bfh_list, axis=0), axis=0)
            else:
                wfh_cat = jnp.zeros((2 * H, 8), jnp.float32)         # dummy zero map
                bfh_sum = jnp.zeros((2 * H,), jnp.float32)
            self.params.append(dict(
                wih=wih, bih=bih, whh=whh, bhh=bhh,
                wfh_list=wfh_list, bfh_list=bfh_list,
                wih_t=wih.T, wfh_t=wfh_cat.T, whh_t=whh.T,
                bih_row=bih.reshape(1, -1),
                bfh_row=bfh_sum.reshape(1, -1),
                bhh_row=bhh.reshape(1, -1),
                H=H))

    def __call__(self, input_feats):
        # TODO(synk): training-mode nn.Dropout(p=0.5) on the inputs is not
        # implemented; forward here is eval-mode (dropout == identity).
        outputs, hiddens = [], []
        for i, p in enumerate(self.params):
            if p is None:
                continue
            x = input_feats[i]
            B, S, _ = x.shape
            aux = [input_feats[pos] for pos in self.auxiliary_pos[i]]
            if aux:
                f_cat = jnp.concatenate(aux, axis=-1)
            else:
                f_cat = jnp.zeros((B, S, p["wfh_t"].shape[0]), x.dtype)
            eo, eh = _gru_gcc_forward(
                x, f_cat, p["wih_t"], p["bih_row"], p["wfh_t"], p["bfh_row"],
                p["whh_t"], p["bhh_row"])
            outputs.append(eo)
            hiddens.append(eh)
        outputs = [outputs[-1]]
        return outputs, hiddens


# -----------------------------------------------------------------------------
# Pure-JAX reference of the (eval-mode) PyTorch forward, for sanity checking.
# -----------------------------------------------------------------------------
def _gru_gcc_reference(x, aux_list, wih, bih, wfh_list, bfh_list, whh, bhh):
    B, S, _ = x.shape
    H = whh.shape[1]
    hp = jax.lax.Precision.HIGHEST
    h = jnp.zeros((B, H), jnp.float32)
    outs = []
    for t in range(S):
        gi = jnp.dot(x[:, t, :], wih.T, precision=hp) + bih
        gh = jnp.dot(h, whh.T, precision=hp) + bhh
        i_r, i_i, i_n = jnp.split(gi, 3, axis=1)
        h_r, h_i, h_n = jnp.split(gh, 3, axis=1)
        f_r = f_i = 0.0
        if aux_list:
            gf = 0.0
            for f, wf, bf in zip(aux_list, wfh_list, bfh_list):
                gf = gf + jnp.dot(f[:, t, :], wf.T, precision=hp) + bf
            f_r, f_i = jnp.split(gf, 2, axis=1)
        r = _sigmoid(i_r + h_r + f_r)
        z = _sigmoid(i_i + h_i + f_i)
        n = jnp.tanh(i_n + r * h_n)
        h = n + z * (h - n)
        outs.append(h)
    return jnp.stack(outs, axis=1), h


if __name__ == "__main__":
    key = jax.random.PRNGKey(0)
    batch, seq, hidden = 2, 8, 32
    input_sizes = [24, 40]            # [aux stream, main stream]
    output_sizes = [hidden, hidden]
    auxiliary_pos = [[], [0]]         # stream 1 uses stream 0 as auxiliary
    skip_info = [1, 0]                # stream 0 has no encoder (default config)

    key, mkey = jax.random.split(key)
    enc = EncoderBaseline(input_sizes, output_sizes, auxiliary_pos,
                          skip_info, mkey)

    input_feats = []
    for d in input_sizes:
        key, xk = jax.random.split(key)
        input_feats.append(jax.random.normal(xk, (batch, seq, d), jnp.float32))

    outputs, hiddens = enc(input_feats)
    outputs = [jax.block_until_ready(o) for o in outputs]
    hiddens = [jax.block_until_ready(h) for h in hiddens]

    p = enc.params[1]
    ref_out, ref_h = _gru_gcc_reference(
        input_feats[1], [input_feats[0]],
        p["wih"], p["bih"], p["wfh_list"], p["bfh_list"], p["whh"], p["bhh"])

    assert outputs[0].shape == (batch, seq, hidden)
    assert hiddens[0].shape == (batch, hidden)
    err_o = float(jnp.max(jnp.abs(outputs[0] - ref_out)))
    err_h = float(jnp.max(jnp.abs(hiddens[0] - ref_h)))
    assert err_o < 2e-2, f"output mismatch, max abs err {err_o}"
    assert err_h < 2e-2, f"hidden mismatch, max abs err {err_h}"
    print("KERNEL_OK")
</pallas_src>

<mosaic_0001>
module attributes {stable_mosaic.version = 11 : i64} {
  func.func @_recurrence_kernel(%arg0: i32, %arg1: memref<1x2x96xf32, #tpu.memory_space<vmem>>, %arg2: memref<1x2x64xf32, #tpu.memory_space<vmem>>, %arg3: memref<32x96xf32, #tpu.memory_space<vmem>>, %arg4: memref<1x96xf32, #tpu.memory_space<vmem>>, %arg5: memref<1x2x32xf32, #tpu.memory_space<vmem>>, %arg6: memref<2x32xf32, #tpu.memory_space<vmem>>) attributes {dimension_semantics = [#tpu.dimension_semantics<arbitrary>], iteration_bounds = array<i64: 8>, scalar_prefetch = 0 : i64, scratch_operands = 1 : i64, tpu.core_type = #tpu.core_type<tc>, window_params = [{transform_indices = @transform_0, window_bounds = array<i64: 1, 2, 96>}, {transform_indices = @transform_1, window_bounds = array<i64: 1, 2, 64>}, {pipeline_mode = #tpu.pipeline_mode<synchronous>, transform_indices = @transform_2, window_bounds = array<i64: 32, 96>}, {pipeline_mode = #tpu.pipeline_mode<synchronous>, transform_indices = @transform_3, window_bounds = array<i64: 1, 96>}, {transform_indices = @transform_4, window_bounds = array<i64: 1, 2, 32>}]} {
    %c0_i32 = arith.constant 0 : i32
    %0 = arith.cmpi eq, %arg0, %c0_i32 : i32
    %1 = arith.extui %0 : i1 to i32
    %c0_i32_0 = arith.constant 0 : i32
    %2 = arith.cmpi ne, %1, %c0_i32_0 : i32
    scf.if %2 {
      %cst_23 = arith.constant 0.000000e+00 : f32
      %49 = vector.broadcast %cst_23 : f32 to vector<2x32xf32>
      %c0_24 = arith.constant 0 : index
      %c0_25 = arith.constant 0 : index
      %50 = vector.load %arg6[%c0_24, %c0_25] : memref<2x32xf32, #tpu.memory_space<vmem>>, vector<2x32xf32>
      tpu.vector_store %arg6[%c0_24, %c0_25], %49 {strides = array<i32>} : memref<2x32xf32, #tpu.memory_space<vmem>>, vector<2x32xf32>,
    } else {
    }
    %c0 = arith.constant 0 : index
    %c0_1 = arith.constant 0 : index
    %3 = vector.load %arg6[%c0, %c0_1] : memref<2x32xf32, #tpu.memory_space<vmem>>, vector<2x32xf32>
    %c0_2 = arith.constant 0 : index
    %c0_3 = arith.constant 0 : index
    %4 = vector.load %arg3[%c0_2, %c0_3] : memref<32x96xf32, #tpu.memory_space<vmem>>, vector<32x96xf32>
    %cst = arith.constant dense<0.000000e+00> : vector<2x96xf32>
    %5 = tpu.matmul %3, %4, %cst {dimension_numbers = #tpu.dot_dimension_numbers<[1], [0], [0], [1], [0, 0, 1, 1], [], []>} : vector<2x32xf32>, vector<32x96xf32>, vector<2x96xf32> -> vector<2x96xf32>
    %c0_4 = arith.constant 0 : index
    %c0_5 = arith.constant 0 : index
    %6 = vector.load %arg4[%c0_4, %c0_5] : memref<1x96xf32, #tpu.memory_space<vmem>>, vector<1x96xf32>
    %7 = vector.broadcast %6 : vector<1x96xf32> to vector<2x96xf32>
    %8 = arith.addf %5, %7 : vector<2x96xf32>
    %c0_6 = arith.constant 0 : index
    %c0_7 = arith.constant 0 : index
    %c0_8 = arith.constant 0 : index
    %9 = vector.load %arg1[%c0_6, %c0_7, %c0_8] : memref<1x2x96xf32, #tpu.memory_space<vmem>>, vector<1x2x96xf32>
    %10 = vector.shape_cast %9 : vector<1x2x96xf32> to vector<2x96xf32>
    %c0_9 = arith.constant 0 : index
    %c0_10 = arith.constant 0 : index
    %c0_11 = arith.constant 0 : index
    %11 = vector.load %arg2[%c0_9, %c0_10, %c0_11] : memref<1x2x64xf32, #tpu.memory_space<vmem>>, vector<1x2x64xf32>
    %12 = vector.shape_cast %11 : vector<1x2x64xf32> to vector<2x64xf32>
    %13 = vector.extract_strided_slice %10 {offsets = [0, 0], sizes = [2, 32], strides = [1, 1]} : vector<2x96xf32> to vector<2x32xf32>
    %14 = vector.extract_strided_slice %10 {offsets = [0, 32], sizes = [2, 32], strides = [1, 1]} : vector<2x96xf32> to vector<2x32xf32>
    %15 = vector.extract_strided_slice %10 {offsets = [0, 64], sizes = [2, 32], strides = [1, 1]} : vector<2x96xf32> to vector<2x32xf32>
    %16 = vector.extract_strided_slice %12 {offsets = [0, 0], sizes = [2, 32], strides = [1, 1]} : vector<2x64xf32> to vector<2x32xf32>
    %17 = vector.extract_strided_slice %12 {offsets = [0, 32], sizes = [2, 32], strides = [1, 1]} : vector<2x64xf32> to vector<2x32xf32>
    %18 = vector.extract_strided_slice %8 {offsets = [0, 0], sizes = [2, 32], strides = [1, 1]} : vector<2x96xf32> to vector<2x32xf32>
    %19 = vector.extract_strided_slice %8 {offsets = [0, 32], sizes = [2, 32], strides = [1, 1]} : vector<2x96xf32> to vector<2x32xf32>
    %20 = vector.extract_strided_slice %8 {offsets = [0, 64], sizes = [2, 32], strides = [1, 1]} : vector<2x96xf32> to vector<2x32xf32>
    %21 = arith.addf %13, %18 : vector<2x32xf32>
    %22 = arith.addf %21, %16 : vector<2x32xf32>
    %cst_12 = arith.constant 0.000000e+00 : f32
    %23 = vector.broadcast %cst_12 : f32 to vector<2x32xf32>
    %24 = arith.subf %23, %22 : vector<2x32xf32>
    %25 = math.exp %24 : vector<2x32xf32>
    %cst_13 = arith.constant 1.000000e+00 : f32
    %26 = vector.broadcast %cst_13 : f32 to vector<2x32xf32>
    %27 = arith.addf %26, %25 : vector<2x32xf32>
    %cst_14 = arith.constant 1.000000e+00 : f32
    %28 = vector.broadcast %cst_14 : f32 to vector<2x32xf32>
    %29 = arith.divf %28, %27 : vector<2x32xf32>
    %30 = arith.addf %14, %19 : vector<2x32xf32>
    %31 = arith.addf %30, %17 : vector<2x32xf32>
    %cst_15 = arith.constant 0.000000e+00 : f32
    %32 = vector.broadcast %cst_15 : f32 to vector<2x32xf32>
    %33 = arith.subf %32, %31 : vector<2x32xf32>
    %34 = math.exp %33 : vector<2x32xf32>
    %cst_16 = arith.constant 1.000000e+00 : f32
    %35 = vector.broadcast %cst_16 : f32 to vector<2x32xf32>
    %36 = arith.addf %35, %34 : vector<2x32xf32>
    %cst_17 = arith.constant 1.000000e+00 : f32
    %37 = vector.broadcast %cst_17 : f32 to vector<2x32xf32>
    %38 = arith.divf %37, %36 : vector<2x32xf32>
    %39 = arith.mulf %29, %20 : vector<2x32xf32>
    %40 = arith.addf %15, %39 : vector<2x32xf32>
    %41 = math.tanh %40 : vector<2x32xf32>
    %42 = arith.subf %3, %41 : vector<2x32xf32>
    %43 = arith.mulf %38, %42 : vector<2x32xf32>
    %44 = arith.addf %41, %43 : vector<2x32xf32>
    %c0_18 = arith.constant 0 : index
    %c0_19 = arith.constant 0 : index
    %45 = vector.load %arg6[%c0_18, %c0_19] : memref<2x32xf32, #tpu.memory_space<vmem>>, vector<2x32xf32>
    tpu.vector_store %arg6[%c0_18, %c0_19], %44 {strides = array<i32>} : memref<2x32xf32, #tpu.memory_space<vmem>>, vector<2x32xf32>,
    %c0_20 = arith.constant 0 : index
    %c0_21 = arith.constant 0 : index
    %c0_22 = arith.constant 0 : index
    %46 = vector.load %arg5[%c0_20, %c0_21, %c0_22] : memref<1x2x32xf32, #tpu.memory_space<vmem>>, vector<1x2x32xf32>
    %47 = vector.shape_cast %46 : vector<1x2x32xf32> to vector<2x32xf32>
    %48 = vector.shape_cast %44 : vector<2x32xf32> to vector<1x2x32xf32>
    tpu.vector_store %arg5[%c0_20, %c0_21, %c0_22], %48 {strides = array<i32>} : memref<1x2x32xf32, #tpu.memory_space<vmem>>, vector<1x2x32xf32>,
    return
  }
  func.func @transform_0(%arg0: i32) -> (i32, i32, i32) {
    %c0_i32 = arith.constant 0 : i32
    %c0_i32_0 = arith.constant 0 : i32
    %c0_i32_1 = arith.constant 0 : i32
    return %arg0, %c0_i32, %c0_i32_0 : i32, i32, i32
  }
  func.func @transform_1(%arg0: i32) -> (i32, i32, i32) {
    %c0_i32 = arith.constant 0 : i32
    %c0_i32_0 = arith.constant 0 : i32
    %c0_i32_1 = arith.constant 0 : i32
    return %arg0, %c0_i32, %c0_i32_0 : i32, i32, i32
  }
  func.func @transform_2(%arg0: i32) -> (i32, i32) {
    %c0_i32 = arith.constant 0 : i32
    %c0_i32_0 = arith.constant 0 : i32
    %c0_i32_1 = arith.constant 0 : i32
    return %c0_i32, %c0_i32_0 : i32, i32
  }
  func.func @transform_3(%arg0: i32) -> (i32, i32) {
    %c0_i32 = arith.constant 0 : i32
    %c0_i32_0 = arith.constant 0 : i32
    %c0_i32_1 = arith.constant 0 : i32
    return %c0_i32, %c0_i32_0 : i32, i32
  }
  func.func @transform_4(%arg0: i32) -> (i32, i32, i32) {
    %c0_i32 = arith.constant 0 : i32
    %c0_i32_0 = arith.constant 0 : i32
    %c0_i32_1 = arith.constant 0 : i32
    return %arg0, %c0_i32, %c0_i32_0 : i32, i32, i32
  }
}

module attributes {stable_mosaic.version = 11 : i64} {
  func.func @_proj_kernel(%arg0: i32, %arg1: memref<16x40xf32, #tpu.memory_space<vmem>>, %arg2: memref<16x24xf32, #tpu.memory_space<vmem>>, %arg3: memref<40x96xf32, #tpu.memory_space<vmem>>, %arg4: memref<24x64xf32, #tpu.memory_space<vmem>>, %arg5: memref<1x96xf32, #tpu.memory_space<vmem>>, %arg6: memref<1x64xf32, #tpu.memory_space<vmem>>, %arg7: memref<16x96xf32, #tpu.memory_space<vmem>>, %arg8: memref<16x64xf32, #tpu.memory_space<vmem>>) attributes {dimension_semantics = [#tpu.dimension_semantics<parallel>], iteration_bounds = array<i64: 1>, scalar_prefetch = 0 : i64, scratch_operands = 0 : i64, tpu.core_type = #tpu.core_type<tc>, window_params = [{transform_indices = @transform_0, window_bounds = array<i64: 16, 40>}, {transform_indices = @transform_1, window_bounds = array<i64: 16, 24>}, {pipeline_mode = #tpu.pipeline_mode<synchronous>, transform_indices = @transform_2, window_bounds = array<i64: 40, 96>}, {pipeline_mode = #tpu.pipeline_mode<synchronous>, transform_indices = @transform_3, window_bounds = array<i64: 24, 64>}, {pipeline_mode = #tpu.pipeline_mode<synchronous>, transform_indices = @transform_4, window_bounds = array<i64: 1, 96>}, {pipeline_mode = #tpu.pipeline_mode<synchronous>, transform_indices = @transform_5, window_bounds = array<i64: 1, 64>}, {transform_indices = @transform_6, window_bounds = array<i64: 16, 96>}, {transform_indices = @transform_7, window_bounds = array<i64: 16, 64>}]} {
    %c0 = arith.constant 0 : index
    %c0_0 = arith.constant 0 : index
    %0 = vector.load %arg1[%c0, %c0_0] : memref<16x40xf32, #tpu.memory_space<vmem>>, vector<16x40xf32>
    %c0_1 = arith.constant 0 : index
    %c0_2 = arith.constant 0 : index
    %1 = vector.load %arg3[%c0_1, %c0_2] : memref<40x96xf32, #tpu.memory_space<vmem>>, vector<40x96xf32>
    %cst = arith.constant dense<0.000000e+00> : vector<16x96xf32>
    %2 = tpu.matmul %0, %1, %cst {dimension_numbers = #tpu.dot_dimension_numbers<[1], [0], [0], [1], [0, 0, 1, 1], [], []>} : vector<16x40xf32>, vector<40x96xf32>, vector<16x96xf32> -> vector<16x96xf32>
    %c0_3 = arith.constant 0 : index
    %c0_4 = arith.constant 0 : index
    %3 = vector.load %arg2[%c0_3, %c0_4] : memref<16x24xf32, #tpu.memory_space<vmem>>, vector<16x24xf32>
    %c0_5 = arith.constant 0 : index
    %c0_6 = arith.constant 0 : index
    %4 = vector.load %arg4[%c0_5, %c0_6] : memref<24x64xf32, #tpu.memory_space<vmem>>, vector<24x64xf32>
    %cst_7 = arith.constant dense<0.000000e+00> : vector<16x64xf32>
    %5 = tpu.matmul %3, %4, %cst_7 {dimension_numbers = #tpu.dot_dimension_numbers<[1], [0], [0], [1], [0, 0, 1, 1], [], []>} : vector<16x24xf32>, vector<24x64xf32>, vector<16x64xf32> -> vector<16x64xf32>
    %c0_8 = arith.constant 0 : index
    %c0_9 = arith.constant 0 : index
    %6 = vector.load %arg5[%c0_8, %c0_9] : memref<1x96xf32, #tpu.memory_space<vmem>>, vector<1x96xf32>
    %7 = vector.broadcast %6 : vector<1x96xf32> to vector<16x96xf32>
    %8 = arith.addf %2, %7 : vector<16x96xf32>
    %c0_10 = arith.constant 0 : index
    %c0_11 = arith.constant 0 : index
    %9 = vector.load %arg7[%c0_10, %c0_11] : memref<16x96xf32, #tpu.memory_space<vmem>>, vector<16x96xf32>
    tpu.vector_store %arg7[%c0_10, %c0_11], %8 {strides = array<i32>} : memref<16x96xf32, #tpu.memory_space<vmem>>, vector<16x96xf32>,
    %c0_12 = arith.constant 0 : index
    %c0_13 = arith.constant 0 : index
    %10 = vector.load %arg6[%c0_12, %c0_13] : memref<1x64xf32, #tpu.memory_space<vmem>>, vector<1x64xf32>
    %11 = vector.broadcast %10 : vector<1x64xf32> to vector<16x64xf32>
    %12 = arith.addf %5, %11 : vector<16x64xf32>
    %c0_14 = arith.constant 0 : index
    %c0_15 = arith.constant 0 : index
    %13 = vector.load %arg8[%c0_14, %c0_15] : memref<16x64xf32, #tpu.memory_space<vmem>>, vector<16x64xf32>
    tpu.vector_store %arg8[%c0_14, %c0_15], %12 {strides = array<i32>} : memref<16x64xf32, #tpu.memory_space<vmem>>, vector<16x64xf32>,
    return
  }
  func.func @transform_0(%arg0: i32) -> (i32, i32) {
    %c0_i32 = arith.constant 0 : i32
    %c0_i32_0 = arith.constant 0 : i32
    return %arg0, %c0_i32 : i32, i32
  }
  func.func @transform_1(%arg0: i32) -> (i32, i32) {
    %c0_i32 = arith.constant 0 : i32
    %c0_i32_0 = arith.constant 0 : i32
    return %arg0, %c0_i32 : i32, i32
  }
  func.func @transform_2(%arg0: i32) -> (i32, i32) {
    %c0_i32 = arith.constant 0 : i32
    %c0_i32_0 = arith.constant 0 : i32
    %c0_i32_1 = arith.constant 0 : i32
    return %c0_i32, %c0_i32_0 : i32, i32
  }
  func.func @transform_3(%arg0: i32) -> (i32, i32) {
    %c0_i32 = arith.constant 0 : i32
    %c0_i32_0 = arith.constant 0 : i32
    %c0_i32_1 = arith.constant 0 : i32
    return %c0_i32, %c0_i32_0 : i32, i32
  }
  func.func @transform_4(%arg0: i32) -> (i32, i32) {
    %c0_i32 = arith.constant 0 : i32
    %c0_i32_0 = arith.constant 0 : i32
    %c0_i32_1 = arith.constant 0 : i32
    return %c0_i32, %c0_i32_0 : i32, i32
  }
  func.func @transform_5(%arg0: i32) -> (i32, i32) {
    %c0_i32 = arith.constant 0 : i32
    %c0_i32_0 = arith.constant 0 : i32
    %c0_i32_1 = arith.constant 0 : i32
    return %c0_i32, %c0_i32_0 : i32, i32
  }
  func.func @transform_6(%arg0: i32) -> (i32, i32) {
    %c0_i32 = arith.constant 0 : i32
    %c0_i32_0 = arith.constant 0 : i32
    return %arg0, %c0_i32 : i32, i32
  }
  func.func @transform_7(%arg0: i32) -> (i32, i32) {
    %c0_i32 = arith.constant 0 : i32
    %c0_i32_0 = arith.constant 0 : i32
    return %arg0, %c0_i32 : i32, i32
  }
}

</mosaic_0001>

<bundles_post_ra>
// kernel: _gru_gcc_forward.3
= control target key start
LH: loop header
LB: loop body
LE: loop exit
PB: predicated region body
PF: predicated region fallthrough
CT: control target
= control target key end

     0   :  { %s504_s15 = smov 0   ;;  %s559_s0 = inlined_call_operand.vmem [shape: f32[8,2,96], index: 0, kind: input, shape index: {}]   ;;  %s560_s1 = inlined_call_operand.vmem [shape: f32[8,2,64], index: 1, kind: input, shape index: {}]   ;;  %s561_s2 = inlined_call_operand.vmem [shape: f32[32,96], index: 2, kind: input, shape index: {}]   ;;  %s562_s3 = inlined_call_operand.vmem [shape: f32[1,96], index: 3, kind: input, shape index: {}]   ;;  %s563_s4 = inlined_call_operand.vmem [shape: f32[8,2,32], index: 4, kind: output, shape index: {}]  }
   0x1 LB: > { %s410_s16 = sadd.s32 4294967295, %s471_s15   ;;  %p414_p0 = scmp.ge.s32.totalorder %s471_s15, 1  ;;  %s471_s15 = sphi %s504_s15, %s14_s15  }
   0x2   : > { %p170_p1 = scmp.lt.s32.totalorder %s471_s15, 9 }
   0x4   : > { %p171_p2 = pnand %p414_p0, %p170_p1 }
   0x5   : > { %p198_p3 = scmp.lt.s32.totalorder (!%p171_p2), %s410_s16, 7  ;;  %p418_p4 = scmp.ne.s32.totalorder (!%p171_p2), %s410_s16, 0 }
   0x6   : > { %174 = sbr.rel (%p171_p2) target bundleno = 957 (0x3bd), region = 36 }
   0xd   : > { %s199_s17 = scalar_select %p198_p3, %s410_s16, 7 }
   0xe   : > { %213 = sbr.rel (%p418_p4) target bundleno = 21 (0x15), region = 40  ;;  %vm214_vm0 = vcmask (!%p418_p4), 254976   ;;  %v473_v0 = vmov (!%p418_p4), 0.0  }
   0xf   : > { %s512_s18 = sshll.u32 %s199_s17, 1  ;;  %215 = vst.msk [vmem:[#allocation2] sm:$0x3] (!%p418_p4), %vm214_vm0, %v473_v0 }
  0x10   : > { %s201_s21 = scalar_lea.vmem %s559_s0, %s512_s18  ;;  %s205_s24 = scalar_lea.vmem %s560_s1, %s512_s18 }
  0x11   : > { %s209_s27 = scalar_lea.vmem %s563_s4, %s512_s18 }
  0x15 PF: > { %v217_v1 = vld [vmem:[%s561_s2] sm:$0xff]  ;;  %v218_v2 = vld [vmem:[%s561_s2 + $0x8] sm:$0xff]  ;;  %v219_v3 = vld [vmem:[%s561_s2 + $0x10] sm:$0xff]  ;;  %v474_v4 = vmov 0.0|0.0   ;;  %vm475_vm1 = vmmov 0   ;;  %v476_v7 = vmov 0.0  }
  0x16   : > { %439 = vmatprep.subr.bf16.mxu0 %v474_v4  ;;  %v440_v5 = vpack.c.bf16 %v218_v2, %v217_v1  ;;  %v220_v6 = vld [vmem:[%s561_s2 + $0x18] sm:$0xff]  ;;  %436 = vmatprep.mubr.msk.f32.mxu0 %vm475_vm1, %v476_v7  ;;  %v216_v9 = vld [vmem:[#allocation2] sm:$0x3]  ;;  %vm228_vm2 = vcmask 261120   ;;  %s477_s12 = smov 64   ;;  %s478_s19 = smov 32  }
  0x17   : > { %v443_v8 = vpack.c.bf16 %v220_v6, %v219_v3  ;;  %v419_v10 = vld [vmem:[%s562_s3] ss:$0 sm:$0xff]  ;;  %vm342_vm3 = vcmask 254976  }
  0x18   : > { %441 = vmatpush3.bf16.msra.mxu0 %v440_v5  ;;  %v302_v14 = vld [vmem:[%s201_s21] sm:$0x3] }
  0x19   : > { %442 = vmatprep.subr.bf16.mxu0 %v474_v4  ;;  %v303_v16 = vld [vmem:[%s205_s24] sm:$0x3] }
  0x1c   : > { %444 = vmatpush3.bf16.msra.mxu0 %v443_v8 }
  0x1f   : > { %437 = vmatmul.mubr.msk.f32.vlgmr.msra.gmra.mrb[0].mxu0 %vm228_vm2, %v216_v9 }
  0xf2   : > { %v298_v11 = vpop.f32.mrb[0].mxu0 }
  0xf3   : > { %v299_v12 = vadd.f32 %v419_v10, %v298_v11  ;;  %v438_v13 = vpop.f32.mrb[1].mxu0 }
  0xf5   : > { %313 = vrot.lane.b32.xlu0 %v299_v12, %s477_s12  ;;  %v304_v15 = vadd.f32 %v302_v14, %v299_v12 }
  0xf7   : > { %v305_v17 = vadd.f32 %v304_v15, %v303_v16 }
  0xf9   : > { %v306_v18 = vsub.f32 0.0, %v305_v17 }
  0xfb   : > { %v307_v19 = vmul.f32 1.442695, %v306_v18 }
  0xfd   : > { %459 = vpow2.f32 %v307_v19 }
 0x107   : > { %v460_v20 = vpop.eup %459 }
 0x108   : > { %v309_v21 = vadd.f32 1.0, %v460_v20 }
 0x10a   : > { %461 = vrcp.f32 %v309_v21 }
 0x114   : > { %v462_v22 = vpop.eup %461 }
 0x167   : > { %v314_v23 = vpop.permute.xlu0 %313 }
 0x168   : > { %v316_v24 = vmul.f32 %v462_v22, %v314_v23 }
 0x16a   : > { %318 = vrot.lane.b32.xlu0 %v316_v24, %s477_s12 }
 0x1dc   : > { %v319_v25 = vpop.permute.xlu0 %318 }
 0x1dd   : > { %v321_v26 = vadd.f32 %v319_v25, %v302_v14 }
 0x1df   : > { %463 = vtanh.f32 %v321_v26 }
 0x1e9   : > { %v464_v27 = vpop.eup %463 }
 0x1ea   : > { %324 = vrot.lane.b32.xlu1 %v464_v27, %s477_s12 }
 0x25c   : > { %v325_v28 = vpop.permute.xlu1 %324 }
 0x25d   : > { %v327_v29 = vsub.f32 %v216_v9, %v325_v28 }
 0x25f   : > { %329 = vrot.lane.b32.xlu1 %v327_v29, %s478_s19 }
 0x2d1   : > { %v330_v30 = vpop.permute.xlu1 %329 }
 0x2d2   : > { %v332_v31 = vmul.f32 %v462_v22, %v330_v30 }
 0x2d4   : > { %334 = vrot.lane.b32.xlu0 %v332_v31, %s478_s19 }
 0x346   : > { %v335_v32 = vpop.permute.xlu0 %334 }
 0x347   : > { %v337_v33 = vadd.f32 %v464_v27, %v335_v32 }
 0x349   : > { %339 = vrot.lane.b32.xlu1 %v337_v33, %s477_s12 }
 0x3bb   : > { %v340_v34 = vpop.permute.xlu1 %339 }
 0x3bc   : > { %343 = vst.msk [vmem:[#allocation2] sm:$0x3] %vm342_vm3, %v340_v34  ;;  %344 = vst.msk [vmem:[%s209_s27] sm:$0x3] %vm342_vm3, %v340_v34 }
 0x3bd PF: > { %s14_s15 = sadd.s32 1, %s471_s15  }
 0x3be   : > { %p11_p5 = scmp.ge.s32.totalorder %s14_s15, 10  }
 0x3c0   :  { %13 = sbr.rel (!%p11_p5) target bundleno = 1 (0x1), region = 73 }

// kernel: _gru_gcc_forward.2
= control target key start
LH: loop header
LB: loop body
LE: loop exit
PB: predicated region body
PF: predicated region fallthrough
CT: control target
= control target key end

     0   :  { %vm136_vm0 = vcmask 195584   ;;  %vm44_vm1 = vcmask 326656   ;;  %vm218_vm2 = vcmask 523264   ;;  %vm126_vm3 = vcmask 785408   ;;  %s377_s2 = inlined_call_operand.vmem [shape: f32[40,96], index: 2, kind: input, shape index: {}]   ;;  %s378_s3 = inlined_call_operand.vmem [shape: f32[24,64], index: 3, kind: input, shape index: {}]   ;;  %s379_s1 = inlined_call_operand.vmem [shape: f32[16,24], index: 1, kind: input, shape index: {}]   ;;  %s380_s0 = inlined_call_operand.vmem [shape: f32[16,40], index: 0, kind: input, shape index: {}]   ;;  %s381_s5 = inlined_call_operand.vmem [shape: f32[1,64], index: 5, kind: input, shape index: {}]   ;;  %s382_s4 = inlined_call_operand.vmem [shape: f32[1,96], index: 4, kind: input, shape index: {}]   ;;  %s383_s7 = inlined_call_operand.vmem [shape: f32[16,64], index: 7, kind: output, shape index: {1}]   ;;  %s384_s6 = inlined_call_operand.vmem [shape: f32[16,96], index: 6, kind: output, shape index: {0}]  }
   0x1   :  { %v27_v0 = vld [vmem:[%s377_s2] sm:$0xff]  ;;  %v28_v1 = vld [vmem:[%s377_s2 + $0x8] sm:$0xff]  ;;  %v29_v5 = vld [vmem:[%s377_s2 + $0x10] sm:$0xff] }
   0x2   :  { %v34_v2 = vld [vmem:[%s378_s3] sm:$0xff]  ;;  %v269_v3 = vpack.c.bf16 %v28_v1, %v27_v0  ;;  %v35_v4 = vld [vmem:[%s378_s3 + $0x8] sm:$0xff]  ;;  %v30_v6 = vld [vmem:[%s377_s2 + $0x18] sm:$0xff] }
   0x3   :  { %v277_v7 = vpack.c.bf16 %v35_v4, %v34_v2  ;;  %v273_v8 = vpack.c.bf16 %v30_v6, %v29_v5  ;;  %v32_v9 = vld [vmem:[%s379_s1] sm:$0xff]  ;;  %v36_v10 = vld [vmem:[%s378_s3 + $0x10] sm:$0xff]  ;;  %v33_v13 = vld [vmem:[%s379_s1 + $0x8] sm:$0xff] }
   0x4   :  { %270 = vmatprep.subr.bf16.mxu0 %v269_v3  ;;  %266 = vmatprep.mubr.msk.f32.mxu1 %vm136_vm0, %v32_v9  ;;  %v25_v11 = vld [vmem:[%s380_s0] sm:$0xff]  ;;  %v26_v14 = vld [vmem:[%s380_s0 + $0x8] sm:$0xff] }
   0x5   :  { %272 = vmatpush3.bf16.msra.mxu0 %v269_v3  ;;  %278 = vmatprep.subr.bf16.mxu1 %v277_v7  ;;  %v31_v12 = vld [vmem:[%s377_s2 + $0x20] sm:$0xff] }
   0x6   :  { %274 = vmatprep.subr.bf16.mxu0 %v273_v8  ;;  %280 = vmatpush3.bf16.msra.mxu1 %v277_v7  ;;  %v232_v15 = vld [vmem:[%s381_s5] ss:$0 sm:$0xff] }
   0x7   :  { %264 = vmatprep.subr.mxu1 %v36_v10  ;;  %257 = vmatprep.mubr.msk.f32.mxu0 %vm44_vm1, %v25_v11  ;;  %v229_v18 = vld [vmem:[%s382_s4] ss:$0 sm:$0xff] }
   0x9   :  { %276 = vmatpush3.bf16.msra.mxu0 %v273_v8 }
   0xa   :  { %255 = vmatprep.subr.mxu0 %v31_v12  ;;  %265 = vmatpush3.msra.mxu1 %v36_v10 }
   0xb   :  { %267 = vmatmul.mubr.msk.f32.vlgmr.msra.gmra.mrb[0].mxu1 %vm136_vm0, %v33_v13 }
   0xd   :  { %256 = vmatpush3.msra.mxu0 %v31_v12 }
   0xe   :  { %258 = vmatmul.mubr.msk.f32.vlgmr.msra.gmra.mrb[0].mxu0 %vm44_vm1, %v26_v14 }
  0xde   :  { %v268_v16 = vpop.f32.mrb[0].mxu1 }
  0xdf   :  { %v215_v17 = vadd.f32 %v268_v16, %v232_v15  ;;  %v209_v19 = vpop.f32.mrb[1].mxu1 }
  0xe0   :  { %v210_v20 = vadd.f32 %v232_v15, %v209_v19 }
  0xe1   :  { %220 = vst.msk [vmem:[%s383_s7 + $0x8] sm:$0xff] %vm218_vm2, %v215_v17  ;;  %v259_v21 = vpop.f32.mrb[0].mxu0 }
  0xe2   :  { %v123_v22 = vadd.f32 %v259_v21, %v229_v18  ;;  %219 = vst.msk [vmem:[%s383_s7] sm:$0xff] %vm218_vm2, %v210_v20  ;;  %v117_v23 = vpop.f32.mrb[1].mxu0 }
  0xe3   :  { %v118_v24 = vadd.f32 %v229_v18, %v117_v23 }
  0xe4   :  { %128 = vst.msk [vmem:[%s384_s6 + $0x8] sm:$0xff] %vm126_vm3, %v123_v22 }
  0xe5   :  { %127 = vst.msk [vmem:[%s384_s6] sm:$0xff] %vm126_vm3, %v118_v24 }

</bundles_post_ra>
